<compile_context>
chip_gen: v7x
topology: tpu7x:2x2x1
jax: 0.10.0
libtpu: 0.0.40
codegen_flags: <defaults>
</compile_context>

<pallas_src>
import functools

import jax
import jax.numpy as jnp
from jax import lax
from jax.experimental import pallas as pl
from jax.experimental.pallas import tpu as pltpu

BN_EPS = 1e-5


def _sepconv_kernel(taps, use_mxu, x_ref, mask_ref, dw_ref, pw_ref, bnb_ref,
                    o_ref):
    """taps: static ((tap_idx, is_center, lane_shift), ...) over the K*K taps."""
    x = x_ref[0].astype(jnp.float32)        # (C_p, HWp); kept live for the gate
    w_dw = dw_ref[...]                      # (2, K*K, C_p, 1) per-tap columns
    b1 = bnb_ref[0]                         # (C_p, 1) BN1 shift (scale is
    b2 = bnb_ref[1]                         # (C_p, 1) BN2 shift  folded in pw)

    def depthwise(v, w):
        # Each non-center tap: static lane roll (XLU slot) * precomputed edge
        # mask (1, HWp) * per-sublane weight column (C_p, 1).  No padded
        # scratch and no per-step mask arithmetic (masks are hoisted inputs).
        acc = None
        for t, is_center, shift in taps:
            if is_center:
                tap = v * w[t]
            else:
                tap = pltpu.roll(v, shift=shift, axis=1) * mask_ref[t] * w[t]
            acc = tap if acc is None else acc + tap
        return acc

    def pointwise(v, w2d):
        # Block-diagonal 1x1 conv over the packed images (BN scale prefolded
        # into the rows of w2d).
        if use_mxu:
            # VALU is the binding slot of this kernel; the MXU is idle, so the
            # matmul is effectively free filler (max-not-sum).
            return jnp.dot(w2d, v, preferred_element_type=jnp.float32)
        # Fallback for channel counts that don't fill sublane tiles: C-unrolled
        # VPU FMA (exact f32).
        acc = jnp.zeros((w2d.shape[0], v.shape[1]), jnp.float32)
        for ci in range(v.shape[0]):
            acc = acc + w2d[:, ci:ci + 1] * v[ci:ci + 1, :]
        return acc

    h = depthwise(x, w_dw[0])               # depthwise conv #1
    h = pointwise(h, pw_ref[0])             # 1x1 conv #1 (+ BN1 scale)
    h = jnp.maximum(h + b1, 0.0)            # BN1 shift + ReLU
    h = depthwise(h, w_dw[1])               # depthwise conv #2
    h = pointwise(h, pw_ref[1])             # 1x1 conv #2 (+ BN2 scale)
    h = jax.nn.sigmoid(h + b2)              # BN2 shift + Sigmoid
    o_ref[0] = (h * x).astype(o_ref.dtype)  # gate: op(x) * x


def sep_conv_pallas(x_nchw, params, kernel_size, stride, padding,
                    bn_stats=None, target_block_bytes=1 << 20):
    dw1, pw1, g1, b1, dw2, pw2, g2, b2 = params
    K, p = kernel_size, padding
    N, Cin, H, W = x_nchw.shape
    Cout = pw2.shape[0]
    HW = H * W

    assert stride == 1, "op(x) * x requires stride == 1 (PyTorch errors too)"
    assert 2 * p == K - 1, "padding must preserve the spatial size"
    assert Cout == Cin, "gate op(x) * x requires C_out == C_in"

    # BatchNorm (eval mode) folded to per-channel scale/shift.  Defaults match
    # a freshly initialized module (running_mean=0, running_var=1); pass
    # bn_stats=(rm1, rv1, rm2, rv2) for a trained module.
    if bn_stats is None:
        rm1 = jnp.zeros((Cin,), jnp.float32)
        rv1 = jnp.ones((Cin,), jnp.float32)
        rm2 = jnp.zeros((Cout,), jnp.float32)
        rv2 = jnp.ones((Cout,), jnp.float32)
    else:
        rm1, rv1, rm2, rv2 = bn_stats
    s1 = (g1 / jnp.sqrt(rv1 + BN_EPS)).astype(jnp.float32)
    sh1 = (b1 - rm1 * s1).astype(jnp.float32)
    s2 = (g2 / jnp.sqrt(rv2 + BN_EPS)).astype(jnp.float32)
    sh2 = (b2 - rm2 * s2).astype(jnp.float32)

    # ---- batch packing onto the sublane axis -------------------------------
    # Fill all 8 f32 sublanes (Cin=4 alone leaves every vreg half empty) and
    # keep folding images while blocks stay below ~target_block_bytes so each
    # grid step moves a substantial chunk of HBM.
    HWp = max(128, ((HW + 127) // 128) * 128)      # lane-dense (128-multiple)

    def _pack_ok(bt):
        c_p = bt * Cin
        return (N % bt == 0) and (bt == 1 or c_p <= 8
                                  or c_p * HWp * 4 <= target_block_bytes)

    cands = [bt for bt in range(1, N + 1) if _pack_ok(bt)]
    aligned = [bt for bt in cands if (bt * Cin) % 8 == 0]
    B_t = max(aligned) if aligned else max(cands)
    NG = N // B_t
    C_p = B_t * Cin
    use_mxu = (C_p % 8 == 0)

    # x: NCHW -> (N, Cin, HW) (free reshape), zero-pad lanes to HWp (no-op if
    # already 128-aligned), then group B_t consecutive images per block (free,
    # contiguous reshape — no NCHW<->NHWC transpose traffic in HBM).
    x = x_nchw.reshape(N, Cin, HW)
    if HWp != HW:
        x = jnp.pad(x, ((0, 0), (0, 0), (0, HWp - HW)))
    x = x.reshape(NG, C_p, HWp)

    # ---- parameters (tiny, prepared once in plain JAX) ---------------------
    # Depthwise weights as per-tap per-sublane columns, tiled across the B_t
    # packed images: (2, K*K, C_p, 1).
    def dw_cols(w):
        cols = jnp.transpose(w[:, 0], (1, 2, 0)).reshape(K * K, Cin)
        return jnp.tile(cols, (1, B_t))[:, :, None]
    dw = jnp.stack([dw_cols(dw1), dw_cols(dw2)]).astype(jnp.float32)

    # 1x1 conv weights with the BN scale folded into the output rows, made
    # block-diagonal over the B_t packed images: (2, C_p, C_p).
    def pw_block(w, s):
        w2d = s[:, None] * w[:, :, 0, 0]
        return jnp.kron(jnp.eye(B_t, dtype=jnp.float32), w2d)
    pw = jnp.stack([pw_block(pw1, s1), pw_block(pw2, s2)]).astype(jnp.float32)

    # BN shifts as per-sublane columns: (2, C_p, 1).
    bnb = jnp.stack([jnp.tile(sh1, B_t),
                     jnp.tile(sh2, B_t)])[:, :, None].astype(jnp.float32)

    # ---- grid-invariant depthwise tap table & edge masks (hoisted) ---------
    lane = jnp.arange(HWp, dtype=jnp.int32)
    col, row = lane % W, lane // W
    taps, masks = [], []
    for dy in range(K):
        for dx in range(K):
            oy, ox = dy - p, dx - p
            taps.append((dy * K + dx, oy == 0 and ox == 0,
                         int((-(oy * W + ox)) % HWp)))
            masks.append((col + ox >= 0) & (col + ox < W) &
                         (row + oy >= 0) & (row + oy < H) & (lane < HW))
    mask = jnp.stack(masks).astype(jnp.float32)[:, None, :]   # (K*K, 1, HWp)

    # Advisory cost estimate so XLA schedules surrounding ops sensibly.
    flops = int(N * Cin * HW * (6 * K * K + 4 * Cin + 10))
    bytes_accessed = int(4 * (2 * N * Cin * HW + K * K * HWp)
                         + 4 * (int(dw.size) + int(pw.size) + int(bnb.size)))
    cost = pl.CostEstimate(flops=flops,
                           transcendentals=int(2 * N * Cout * HW),
                           bytes_accessed=bytes_accessed)

    out = pl.pallas_call(
        functools.partial(_sepconv_kernel, tuple(taps), use_mxu),
        out_shape=jax.ShapeDtypeStruct((NG, C_p, HWp), x_nchw.dtype),
        grid_spec=pltpu.PrefetchScalarGridSpec(
            num_scalar_prefetch=0,
            grid=(NG,),
            in_specs=[
                pl.BlockSpec((1, C_p, HWp), lambda n: (n, 0, 0)),         # x
                pl.BlockSpec((K * K, 1, HWp), lambda n: (0, 0, 0)),       # masks
                pl.BlockSpec((2, K * K, C_p, 1), lambda n: (0, 0, 0, 0)),  # dw
                pl.BlockSpec((2, C_p, C_p), lambda n: (0, 0, 0)),         # pw (+BN scale)
                pl.BlockSpec((2, C_p, 1), lambda n: (0, 0, 0)),           # BN shifts
            ],
            out_specs=pl.BlockSpec((1, C_p, HWp), lambda n: (n, 0, 0)),
        ),
        compiler_params=pltpu.CompilerParams(
            dimension_semantics=("parallel",),   # v7x: batch groups across TCs
            vmem_limit_bytes=32 * 1024 * 1024,   # safe on v5e/v6e/v7x; raise
        ),                                       # per-gen when spatial tiling lands
        cost_estimate=cost,
    )(x, mask, dw, pw, bnb)

    out = out.reshape(N, Cout, HWp)[:, :, :HW]
    return out.reshape(N, Cout, H, W)


def sep_conv_ref(x, params, K, stride, p, bn_stats=None):
    """Pure-JAX reference (NCHW, mirrors the PyTorch module in eval mode)."""
    dw1, pw1, g1, b1, dw2, pw2, g2, b2 = params
    Cin = x.shape[1]
    Cout = pw2.shape[0]
    if bn_stats is None:
        rm1 = jnp.zeros((Cin,)); rv1 = jnp.ones((Cin,))
        rm2 = jnp.zeros((Cout,)); rv2 = jnp.ones((Cout,))
    else:
        rm1, rv1, rm2, rv2 = bn_stats

    def conv(lhs, rhs, strides, pads, groups=1):
        dn = lax.conv_dimension_numbers(lhs.shape, rhs.shape,
                                        ("NCHW", "OIHW", "NCHW"))
        return lax.conv_general_dilated(lhs, rhs, strides, pads,
                                        dimension_numbers=dn,
                                        feature_group_count=groups)

    def bn(h, g, b, rm, rv):
        s = g / jnp.sqrt(rv + BN_EPS)
        return ((h - rm[None, :, None, None]) * s[None, :, None, None]
                + b[None, :, None, None])

    h = conv(x, dw1, (stride, stride), [(p, p), (p, p)], groups=Cin)
    h = conv(h, pw1, (1, 1), [(0, 0), (0, 0)])
    h = jnp.maximum(bn(h, g1, b1, rm1, rv1), 0.0)
    h = conv(h, dw2, (1, 1), [(p, p), (p, p)], groups=Cin)
    h = conv(h, pw2, (1, 1), [(0, 0), (0, 0)])
    h = jax.nn.sigmoid(bn(h, g2, b2, rm2, rv2))
    return h * x


if __name__ == "__main__":
    N, Cin, Cout, H, W = 2, 4, 4, 16, 16
    K, stride, pad = 3, 1, 1

    key = jax.random.PRNGKey(0)
    ks = jax.random.split(key, 9)
    x = jax.random.normal(ks[0], (N, Cin, H, W), jnp.float32)
    params = (
        0.3 * jax.random.normal(ks[1], (Cin, 1, K, K), jnp.float32),     # dw 1
        0.3 * jax.random.normal(ks[2], (Cin, Cin, 1, 1), jnp.float32),   # pw 1
        1.0 + 0.1 * jax.random.normal(ks[3], (Cin,), jnp.float32),       # bn1 g
        0.1 * jax.random.normal(ks[4], (Cin,), jnp.float32),             # bn1 b
        0.3 * jax.random.normal(ks[5], (Cin, 1, K, K), jnp.float32),     # dw 2
        0.3 * jax.random.normal(ks[6], (Cout, Cin, 1, 1), jnp.float32),  # pw 2
        1.0 + 0.1 * jax.random.normal(ks[7], (Cout,), jnp.float32),      # bn2 g
        0.1 * jax.random.normal(ks[8], (Cout,), jnp.float32),            # bn2 b
    )

    out = jax.block_until_ready(sep_conv_pallas(x, params, K, stride, pad))
    ref = jax.block_until_ready(sep_conv_ref(x, params, K, stride, pad))

    assert out.shape == (N, Cout, H, W), out.shape
    # The 1x1 convs now run on the MXU; f32 MXU matmuls may use bf16 passes on
    # some generations, so compare at a slightly relaxed (but tight) tolerance.
    assert jnp.allclose(out, ref, atol=2e-3, rtol=2e-3), \
        float(jnp.max(jnp.abs(out - ref)))
    print("KERNEL_OK")
</pallas_src>

<mosaic_0001>
module attributes {stable_mosaic.version = 11 : i64} {
  func.func @_sepconv_kernel(%arg0: i32, %arg1: memref<1x8x256xf32, #tpu.memory_space<vmem>>, %arg2: memref<9x1x256xf32, #tpu.memory_space<vmem>>, %arg3: memref<2x9x8x1xf32, #tpu.memory_space<vmem>>, %arg4: memref<2x8x8xf32, #tpu.memory_space<vmem>>, %arg5: memref<2x8x1xf32, #tpu.memory_space<vmem>>, %arg6: memref<1x8x256xf32, #tpu.memory_space<vmem>>) attributes {dimension_semantics = [#tpu.dimension_semantics<parallel>], iteration_bounds = array<i64: 1>, scalar_prefetch = 0 : i64, scratch_operands = 0 : i64, tpu.core_type = #tpu.core_type<tc>, window_params = [{transform_indices = @transform_0, window_bounds = array<i64: 1, 8, 256>}, {pipeline_mode = #tpu.pipeline_mode<synchronous>, transform_indices = @transform_1, window_bounds = array<i64: 9, 1, 256>}, {pipeline_mode = #tpu.pipeline_mode<synchronous>, transform_indices = @transform_2, window_bounds = array<i64: 2, 9, 8, 1>}, {pipeline_mode = #tpu.pipeline_mode<synchronous>, transform_indices = @transform_3, window_bounds = array<i64: 2, 8, 8>}, {pipeline_mode = #tpu.pipeline_mode<synchronous>, transform_indices = @transform_4, window_bounds = array<i64: 2, 8, 1>}, {transform_indices = @transform_5, window_bounds = array<i64: 1, 8, 256>}]} {
    %c0 = arith.constant 0 : index
    %c0_0 = arith.constant 0 : index
    %c0_1 = arith.constant 0 : index
    %0 = vector.load %arg1[%c0, %c0_0, %c0_1] : memref<1x8x256xf32, #tpu.memory_space<vmem>>, vector<1x8x256xf32>
    %1 = vector.shape_cast %0 : vector<1x8x256xf32> to vector<8x256xf32>
    %c0_2 = arith.constant 0 : index
    %c0_3 = arith.constant 0 : index
    %c0_4 = arith.constant 0 : index
    %c0_5 = arith.constant 0 : index
    %2 = vector.load %arg3[%c0_2, %c0_3, %c0_4, %c0_5] : memref<2x9x8x1xf32, #tpu.memory_space<vmem>>, vector<2x9x8x1xf32>
    %c0_6 = arith.constant 0 : index
    %c0_7 = arith.constant 0 : index
    %c0_8 = arith.constant 0 : index
    %3 = vector.load %arg5[%c0_6, %c0_7, %c0_8] : memref<2x8x1xf32, #tpu.memory_space<vmem>>, vector<1x8x1xf32>
    %4 = vector.shape_cast %3 : vector<1x8x1xf32> to vector<8x1xf32>
    %c1 = arith.constant 1 : index
    %c0_9 = arith.constant 0 : index
    %c0_10 = arith.constant 0 : index
    %5 = vector.load %arg5[%c1, %c0_9, %c0_10] : memref<2x8x1xf32, #tpu.memory_space<vmem>>, vector<1x8x1xf32>
    %6 = vector.shape_cast %5 : vector<1x8x1xf32> to vector<8x1xf32>
    %7 = vector.extract_strided_slice %2 {offsets = [0, 0, 0, 0], sizes = [1, 9, 8, 1], strides = [1, 1, 1, 1]} : vector<2x9x8x1xf32> to vector<1x9x8x1xf32>
    %8 = vector.shape_cast %7 : vector<1x9x8x1xf32> to vector<9x8x1xf32>
    %c17_i32 = arith.constant 17 : i32
    %9 = tpu.dynamic_rotate %1 by %c17_i32 dim 1 : vector<8x256xf32>, i32 -> vector<8x256xf32>
    %c0_11 = arith.constant 0 : index
    %c0_12 = arith.constant 0 : index
    %c0_13 = arith.constant 0 : index
    %10 = vector.load %arg2[%c0_11, %c0_12, %c0_13] : memref<9x1x256xf32, #tpu.memory_space<vmem>>, vector<1x1x256xf32>
    %11 = vector.shape_cast %10 : vector<1x1x256xf32> to vector<1x256xf32>
    %12 = vector.broadcast %11 : vector<1x256xf32> to vector<8x256xf32>
    %13 = arith.mulf %9, %12 : vector<8x256xf32>
    %14 = vector.extract_strided_slice %8 {offsets = [0, 0, 0], sizes = [1, 8, 1], strides = [1, 1, 1]} : vector<9x8x1xf32> to vector<1x8x1xf32>
    %15 = vector.shape_cast %14 : vector<1x8x1xf32> to vector<8x1xf32>
    %16 = vector.broadcast %15 : vector<8x1xf32> to vector<8x256xf32>
    %17 = arith.mulf %13, %16 : vector<8x256xf32>
    %c16_i32 = arith.constant 16 : i32
    %18 = tpu.dynamic_rotate %1 by %c16_i32 dim 1 : vector<8x256xf32>, i32 -> vector<8x256xf32>
    %c1_14 = arith.constant 1 : index
    %c0_15 = arith.constant 0 : index
    %c0_16 = arith.constant 0 : index
    %19 = vector.load %arg2[%c1_14, %c0_15, %c0_16] : memref<9x1x256xf32, #tpu.memory_space<vmem>>, vector<1x1x256xf32>
    %20 = vector.shape_cast %19 : vector<1x1x256xf32> to vector<1x256xf32>
    %21 = vector.broadcast %20 : vector<1x256xf32> to vector<8x256xf32>
    %22 = arith.mulf %18, %21 : vector<8x256xf32>
    %23 = vector.extract_strided_slice %8 {offsets = [1, 0, 0], sizes = [1, 8, 1], strides = [1, 1, 1]} : vector<9x8x1xf32> to vector<1x8x1xf32>
    %24 = vector.shape_cast %23 : vector<1x8x1xf32> to vector<8x1xf32>
    %25 = vector.broadcast %24 : vector<8x1xf32> to vector<8x256xf32>
    %26 = arith.mulf %22, %25 : vector<8x256xf32>
    %27 = arith.addf %17, %26 : vector<8x256xf32>
    %c15_i32 = arith.constant 15 : i32
    %28 = tpu.dynamic_rotate %1 by %c15_i32 dim 1 : vector<8x256xf32>, i32 -> vector<8x256xf32>
    %c2 = arith.constant 2 : index
    %c0_17 = arith.constant 0 : index
    %c0_18 = arith.constant 0 : index
    %29 = vector.load %arg2[%c2, %c0_17, %c0_18] : memref<9x1x256xf32, #tpu.memory_space<vmem>>, vector<1x1x256xf32>
    %30 = vector.shape_cast %29 : vector<1x1x256xf32> to vector<1x256xf32>
    %31 = vector.broadcast %30 : vector<1x256xf32> to vector<8x256xf32>
    %32 = arith.mulf %28, %31 : vector<8x256xf32>
    %33 = vector.extract_strided_slice %8 {offsets = [2, 0, 0], sizes = [1, 8, 1], strides = [1, 1, 1]} : vector<9x8x1xf32> to vector<1x8x1xf32>
    %34 = vector.shape_cast %33 : vector<1x8x1xf32> to vector<8x1xf32>
    %35 = vector.broadcast %34 : vector<8x1xf32> to vector<8x256xf32>
    %36 = arith.mulf %32, %35 : vector<8x256xf32>
    %37 = arith.addf %27, %36 : vector<8x256xf32>
    %c1_i32 = arith.constant 1 : i32
    %38 = tpu.dynamic_rotate %1 by %c1_i32 dim 1 : vector<8x256xf32>, i32 -> vector<8x256xf32>
    %c3 = arith.constant 3 : index
    %c0_19 = arith.constant 0 : index
    %c0_20 = arith.constant 0 : index
    %39 = vector.load %arg2[%c3, %c0_19, %c0_20] : memref<9x1x256xf32, #tpu.memory_space<vmem>>, vector<1x1x256xf32>
    %40 = vector.shape_cast %39 : vector<1x1x256xf32> to vector<1x256xf32>
    %41 = vector.broadcast %40 : vector<1x256xf32> to vector<8x256xf32>
    %42 = arith.mulf %38, %41 : vector<8x256xf32>
    %43 = vector.extract_strided_slice %8 {offsets = [3, 0, 0], sizes = [1, 8, 1], strides = [1, 1, 1]} : vector<9x8x1xf32> to vector<1x8x1xf32>
    %44 = vector.shape_cast %43 : vector<1x8x1xf32> to vector<8x1xf32>
    %45 = vector.broadcast %44 : vector<8x1xf32> to vector<8x256xf32>
    %46 = arith.mulf %42, %45 : vector<8x256xf32>
    %47 = arith.addf %37, %46 : vector<8x256xf32>
    %48 = vector.extract_strided_slice %8 {offsets = [4, 0, 0], sizes = [1, 8, 1], strides = [1, 1, 1]} : vector<9x8x1xf32> to vector<1x8x1xf32>
    %49 = vector.shape_cast %48 : vector<1x8x1xf32> to vector<8x1xf32>
    %50 = vector.broadcast %49 : vector<8x1xf32> to vector<8x256xf32>
    %51 = arith.mulf %1, %50 : vector<8x256xf32>
    %52 = arith.addf %47, %51 : vector<8x256xf32>
    %c255_i32 = arith.constant 255 : i32
    %53 = tpu.dynamic_rotate %1 by %c255_i32 dim 1 : vector<8x256xf32>, i32 -> vector<8x256xf32>
    %c5 = arith.constant 5 : index
    %c0_21 = arith.constant 0 : index
    %c0_22 = arith.constant 0 : index
    %54 = vector.load %arg2[%c5, %c0_21, %c0_22] : memref<9x1x256xf32, #tpu.memory_space<vmem>>, vector<1x1x256xf32>
    %55 = vector.shape_cast %54 : vector<1x1x256xf32> to vector<1x256xf32>
    %56 = vector.broadcast %55 : vector<1x256xf32> to vector<8x256xf32>
    %57 = arith.mulf %53, %56 : vector<8x256xf32>
    %58 = vector.extract_strided_slice %8 {offsets = [5, 0, 0], sizes = [1, 8, 1], strides = [1, 1, 1]} : vector<9x8x1xf32> to vector<1x8x1xf32>
    %59 = vector.shape_cast %58 : vector<1x8x1xf32> to vector<8x1xf32>
    %60 = vector.broadcast %59 : vector<8x1xf32> to vector<8x256xf32>
    %61 = arith.mulf %57, %60 : vector<8x256xf32>
    %62 = arith.addf %52, %61 : vector<8x256xf32>
    %c241_i32 = arith.constant 241 : i32
    %63 = tpu.dynamic_rotate %1 by %c241_i32 dim 1 : vector<8x256xf32>, i32 -> vector<8x256xf32>
    %c6 = arith.constant 6 : index
    %c0_23 = arith.constant 0 : index
    %c0_24 = arith.constant 0 : index
    %64 = vector.load %arg2[%c6, %c0_23, %c0_24] : memref<9x1x256xf32, #tpu.memory_space<vmem>>, vector<1x1x256xf32>
    %65 = vector.shape_cast %64 : vector<1x1x256xf32> to vector<1x256xf32>
    %66 = vector.broadcast %65 : vector<1x256xf32> to vector<8x256xf32>
    %67 = arith.mulf %63, %66 : vector<8x256xf32>
    %68 = vector.extract_strided_slice %8 {offsets = [6, 0, 0], sizes = [1, 8, 1], strides = [1, 1, 1]} : vector<9x8x1xf32> to vector<1x8x1xf32>
    %69 = vector.shape_cast %68 : vector<1x8x1xf32> to vector<8x1xf32>
    %70 = vector.broadcast %69 : vector<8x1xf32> to vector<8x256xf32>
    %71 = arith.mulf %67, %70 : vector<8x256xf32>
    %72 = arith.addf %62, %71 : vector<8x256xf32>
    %c240_i32 = arith.constant 240 : i32
    %73 = tpu.dynamic_rotate %1 by %c240_i32 dim 1 : vector<8x256xf32>, i32 -> vector<8x256xf32>
    %c7 = arith.constant 7 : index
    %c0_25 = arith.constant 0 : index
    %c0_26 = arith.constant 0 : index
    %74 = vector.load %arg2[%c7, %c0_25, %c0_26] : memref<9x1x256xf32, #tpu.memory_space<vmem>>, vector<1x1x256xf32>
    %75 = vector.shape_cast %74 : vector<1x1x256xf32> to vector<1x256xf32>
    %76 = vector.broadcast %75 : vector<1x256xf32> to vector<8x256xf32>
    %77 = arith.mulf %73, %76 : vector<8x256xf32>
    %78 = vector.extract_strided_slice %8 {offsets = [7, 0, 0], sizes = [1, 8, 1], strides = [1, 1, 1]} : vector<9x8x1xf32> to vector<1x8x1xf32>
    %79 = vector.shape_cast %78 : vector<1x8x1xf32> to vector<8x1xf32>
    %80 = vector.broadcast %79 : vector<8x1xf32> to vector<8x256xf32>
    %81 = arith.mulf %77, %80 : vector<8x256xf32>
    %82 = arith.addf %72, %81 : vector<8x256xf32>
    %c239_i32 = arith.constant 239 : i32
    %83 = tpu.dynamic_rotate %1 by %c239_i32 dim 1 : vector<8x256xf32>, i32 -> vector<8x256xf32>
    %c8 = arith.constant 8 : index
    %c0_27 = arith.constant 0 : index
    %c0_28 = arith.constant 0 : index
    %84 = vector.load %arg2[%c8, %c0_27, %c0_28] : memref<9x1x256xf32, #tpu.memory_space<vmem>>, vector<1x1x256xf32>
    %85 = vector.shape_cast %84 : vector<1x1x256xf32> to vector<1x256xf32>
    %86 = vector.broadcast %85 : vector<1x256xf32> to vector<8x256xf32>
    %87 = arith.mulf %83, %86 : vector<8x256xf32>
    %88 = vector.extract_strided_slice %8 {offsets = [8, 0, 0], sizes = [1, 8, 1], strides = [1, 1, 1]} : vector<9x8x1xf32> to vector<1x8x1xf32>
    %89 = vector.shape_cast %88 : vector<1x8x1xf32> to vector<8x1xf32>
    %90 = vector.broadcast %89 : vector<8x1xf32> to vector<8x256xf32>
    %91 = arith.mulf %87, %90 : vector<8x256xf32>
    %92 = arith.addf %82, %91 : vector<8x256xf32>
    %c0_29 = arith.constant 0 : index
    %c0_30 = arith.constant 0 : index
    %c0_31 = arith.constant 0 : index
    %93 = vector.load %arg4[%c0_29, %c0_30, %c0_31] : memref<2x8x8xf32, #tpu.memory_space<vmem>>, vector<1x8x8xf32>
    %94 = vector.shape_cast %93 : vector<1x8x8xf32> to vector<8x8xf32>
    %cst = arith.constant dense<0.000000e+00> : vector<8x256xf32>
    %95 = tpu.matmul %94, %92, %cst {dimension_numbers = #tpu.dot_dimension_numbers<[1], [0], [0], [1], [0, 0, 1, 1], [], []>} : vector<8x8xf32>, vector<8x256xf32>, vector<8x256xf32> -> vector<8x256xf32>
    %96 = vector.broadcast %4 : vector<8x1xf32> to vector<8x256xf32>
    %97 = arith.addf %95, %96 : vector<8x256xf32>
    %cst_32 = arith.constant 0.000000e+00 : f32
    %98 = vector.broadcast %cst_32 : f32 to vector<8x256xf32>
    %99 = arith.maximumf %97, %98 : vector<8x256xf32>
    %100 = vector.extract_strided_slice %2 {offsets = [1, 0, 0, 0], sizes = [1, 9, 8, 1], strides = [1, 1, 1, 1]} : vector<2x9x8x1xf32> to vector<1x9x8x1xf32>
    %101 = vector.shape_cast %100 : vector<1x9x8x1xf32> to vector<9x8x1xf32>
    %c17_i32_33 = arith.constant 17 : i32
    %102 = tpu.dynamic_rotate %99 by %c17_i32_33 dim 1 : vector<8x256xf32>, i32 -> vector<8x256xf32>
    %c0_34 = arith.constant 0 : index
    %c0_35 = arith.constant 0 : index
    %c0_36 = arith.constant 0 : index
    %103 = vector.load %arg2[%c0_34, %c0_35, %c0_36] : memref<9x1x256xf32, #tpu.memory_space<vmem>>, vector<1x1x256xf32>
    %104 = vector.shape_cast %103 : vector<1x1x256xf32> to vector<1x256xf32>
    %105 = vector.broadcast %104 : vector<1x256xf32> to vector<8x256xf32>
    %106 = arith.mulf %102, %105 : vector<8x256xf32>
    %107 = vector.extract_strided_slice %101 {offsets = [0, 0, 0], sizes = [1, 8, 1], strides = [1, 1, 1]} : vector<9x8x1xf32> to vector<1x8x1xf32>
    %108 = vector.shape_cast %107 : vector<1x8x1xf32> to vector<8x1xf32>
    %109 = vector.broadcast %108 : vector<8x1xf32> to vector<8x256xf32>
    %110 = arith.mulf %106, %109 : vector<8x256xf32>
    %c16_i32_37 = arith.constant 16 : i32
    %111 = tpu.dynamic_rotate %99 by %c16_i32_37 dim 1 : vector<8x256xf32>, i32 -> vector<8x256xf32>
    %c1_38 = arith.constant 1 : index
    %c0_39 = arith.constant 0 : index
    %c0_40 = arith.constant 0 : index
    %112 = vector.load %arg2[%c1_38, %c0_39, %c0_40] : memref<9x1x256xf32, #tpu.memory_space<vmem>>, vector<1x1x256xf32>
    %113 = vector.shape_cast %112 : vector<1x1x256xf32> to vector<1x256xf32>
    %114 = vector.broadcast %113 : vector<1x256xf32> to vector<8x256xf32>
    %115 = arith.mulf %111, %114 : vector<8x256xf32>
    %116 = vector.extract_strided_slice %101 {offsets = [1, 0, 0], sizes = [1, 8, 1], strides = [1, 1, 1]} : vector<9x8x1xf32> to vector<1x8x1xf32>
    %117 = vector.shape_cast %116 : vector<1x8x1xf32> to vector<8x1xf32>
    %118 = vector.broadcast %117 : vector<8x1xf32> to vector<8x256xf32>
    %119 = arith.mulf %115, %118 : vector<8x256xf32>
    %120 = arith.addf %110, %119 : vector<8x256xf32>
    %c15_i32_41 = arith.constant 15 : i32
    %121 = tpu.dynamic_rotate %99 by %c15_i32_41 dim 1 : vector<8x256xf32>, i32 -> vector<8x256xf32>
    %c2_42 = arith.constant 2 : index
    %c0_43 = arith.constant 0 : index
    %c0_44 = arith.constant 0 : index
    %122 = vector.load %arg2[%c2_42, %c0_43, %c0_44] : memref<9x1x256xf32, #tpu.memory_space<vmem>>, vector<1x1x256xf32>
    %123 = vector.shape_cast %122 : vector<1x1x256xf32> to vector<1x256xf32>
    %124 = vector.broadcast %123 : vector<1x256xf32> to vector<8x256xf32>
    %125 = arith.mulf %121, %124 : vector<8x256xf32>
    %126 = vector.extract_strided_slice %101 {offsets = [2, 0, 0], sizes = [1, 8, 1], strides = [1, 1, 1]} : vector<9x8x1xf32> to vector<1x8x1xf32>
    %127 = vector.shape_cast %126 : vector<1x8x1xf32> to vector<8x1xf32>
    %128 = vector.broadcast %127 : vector<8x1xf32> to vector<8x256xf32>
    %129 = arith.mulf %125, %128 : vector<8x256xf32>
    %130 = arith.addf %120, %129 : vector<8x256xf32>
    %c1_i32_45 = arith.constant 1 : i32
    %131 = tpu.dynamic_rotate %99 by %c1_i32_45 dim 1 : vector<8x256xf32>, i32 -> vector<8x256xf32>
    %c3_46 = arith.constant 3 : index
    %c0_47 = arith.constant 0 : index
    %c0_48 = arith.constant 0 : index
    %132 = vector.load %arg2[%c3_46, %c0_47, %c0_48] : memref<9x1x256xf32, #tpu.memory_space<vmem>>, vector<1x1x256xf32>
    %133 = vector.shape_cast %132 : vector<1x1x256xf32> to vector<1x256xf32>
    %134 = vector.broadcast %133 : vector<1x256xf32> to vector<8x256xf32>
    %135 = arith.mulf %131, %134 : vector<8x256xf32>
    %136 = vector.extract_strided_slice %101 {offsets = [3, 0, 0], sizes = [1, 8, 1], strides = [1, 1, 1]} : vector<9x8x1xf32> to vector<1x8x1xf32>
    %137 = vector.shape_cast %136 : vector<1x8x1xf32> to vector<8x1xf32>
    %138 = vector.broadcast %137 : vector<8x1xf32> to vector<8x256xf32>
    %139 = arith.mulf %135, %138 : vector<8x256xf32>
    %140 = arith.addf %130, %139 : vector<8x256xf32>
    %141 = vector.extract_strided_slice %101 {offsets = [4, 0, 0], sizes = [1, 8, 1], strides = [1, 1, 1]} : vector<9x8x1xf32> to vector<1x8x1xf32>
    %142 = vector.shape_cast %141 : vector<1x8x1xf32> to vector<8x1xf32>
    %143 = vector.broadcast %142 : vector<8x1xf32> to vector<8x256xf32>
    %144 = arith.mulf %99, %143 : vector<8x256xf32>
    %145 = arith.addf %140, %144 : vector<8x256xf32>
    %c255_i32_49 = arith.constant 255 : i32
    %146 = tpu.dynamic_rotate %99 by %c255_i32_49 dim 1 : vector<8x256xf32>, i32 -> vector<8x256xf32>
    %c5_50 = arith.constant 5 : index
    %c0_51 = arith.constant 0 : index
    %c0_52 = arith.constant 0 : index
    %147 = vector.load %arg2[%c5_50, %c0_51, %c0_52] : memref<9x1x256xf32, #tpu.memory_space<vmem>>, vector<1x1x256xf32>
    %148 = vector.shape_cast %147 : vector<1x1x256xf32> to vector<1x256xf32>
    %149 = vector.broadcast %148 : vector<1x256xf32> to vector<8x256xf32>
    %150 = arith.mulf %146, %149 : vector<8x256xf32>
    %151 = vector.extract_strided_slice %101 {offsets = [5, 0, 0], sizes = [1, 8, 1], strides = [1, 1, 1]} : vector<9x8x1xf32> to vector<1x8x1xf32>
    %152 = vector.shape_cast %151 : vector<1x8x1xf32> to vector<8x1xf32>
    %153 = vector.broadcast %152 : vector<8x1xf32> to vector<8x256xf32>
    %154 = arith.mulf %150, %153 : vector<8x256xf32>
    %155 = arith.addf %145, %154 : vector<8x256xf32>
    %c241_i32_53 = arith.constant 241 : i32
    %156 = tpu.dynamic_rotate %99 by %c241_i32_53 dim 1 : vector<8x256xf32>, i32 -> vector<8x256xf32>
    %c6_54 = arith.constant 6 : index
    %c0_55 = arith.constant 0 : index
    %c0_56 = arith.constant 0 : index
    %157 = vector.load %arg2[%c6_54, %c0_55, %c0_56] : memref<9x1x256xf32, #tpu.memory_space<vmem>>, vector<1x1x256xf32>
    %158 = vector.shape_cast %157 : vector<1x1x256xf32> to vector<1x256xf32>
    %159 = vector.broadcast %158 : vector<1x256xf32> to vector<8x256xf32>
    %160 = arith.mulf %156, %159 : vector<8x256xf32>
    %161 = vector.extract_strided_slice %101 {offsets = [6, 0, 0], sizes = [1, 8, 1], strides = [1, 1, 1]} : vector<9x8x1xf32> to vector<1x8x1xf32>
    %162 = vector.shape_cast %161 : vector<1x8x1xf32> to vector<8x1xf32>
    %163 = vector.broadcast %162 : vector<8x1xf32> to vector<8x256xf32>
    %164 = arith.mulf %160, %163 : vector<8x256xf32>
    %165 = arith.addf %155, %164 : vector<8x256xf32>
    %c240_i32_57 = arith.constant 240 : i32
    %166 = tpu.dynamic_rotate %99 by %c240_i32_57 dim 1 : vector<8x256xf32>, i32 -> vector<8x256xf32>
    %c7_58 = arith.constant 7 : index
    %c0_59 = arith.constant 0 : index
    %c0_60 = arith.constant 0 : index
    %167 = vector.load %arg2[%c7_58, %c0_59, %c0_60] : memref<9x1x256xf32, #tpu.memory_space<vmem>>, vector<1x1x256xf32>
    %168 = vector.shape_cast %167 : vector<1x1x256xf32> to vector<1x256xf32>
    %169 = vector.broadcast %168 : vector<1x256xf32> to vector<8x256xf32>
    %170 = arith.mulf %166, %169 : vector<8x256xf32>
    %171 = vector.extract_strided_slice %101 {offsets = [7, 0, 0], sizes = [1, 8, 1], strides = [1, 1, 1]} : vector<9x8x1xf32> to vector<1x8x1xf32>
    %172 = vector.shape_cast %171 : vector<1x8x1xf32> to vector<8x1xf32>
    %173 = vector.broadcast %172 : vector<8x1xf32> to vector<8x256xf32>
    %174 = arith.mulf %170, %173 : vector<8x256xf32>
    %175 = arith.addf %165, %174 : vector<8x256xf32>
    %c239_i32_61 = arith.constant 239 : i32
    %176 = tpu.dynamic_rotate %99 by %c239_i32_61 dim 1 : vector<8x256xf32>, i32 -> vector<8x256xf32>
    %c8_62 = arith.constant 8 : index
    %c0_63 = arith.constant 0 : index
    %c0_64 = arith.constant 0 : index
    %177 = vector.load %arg2[%c8_62, %c0_63, %c0_64] : memref<9x1x256xf32, #tpu.memory_space<vmem>>, vector<1x1x256xf32>
    %178 = vector.shape_cast %177 : vector<1x1x256xf32> to vector<1x256xf32>
    %179 = vector.broadcast %178 : vector<1x256xf32> to vector<8x256xf32>
    %180 = arith.mulf %176, %179 : vector<8x256xf32>
    %181 = vector.extract_strided_slice %101 {offsets = [8, 0, 0], sizes = [1, 8, 1], strides = [1, 1, 1]} : vector<9x8x1xf32> to vector<1x8x1xf32>
    %182 = vector.shape_cast %181 : vector<1x8x1xf32> to vector<8x1xf32>
    %183 = vector.broadcast %182 : vector<8x1xf32> to vector<8x256xf32>
    %184 = arith.mulf %180, %183 : vector<8x256xf32>
    %185 = arith.addf %175, %184 : vector<8x256xf32>
    %c1_65 = arith.constant 1 : index
    %c0_66 = arith.constant 0 : index
    %c0_67 = arith.constant 0 : index
    %186 = vector.load %arg4[%c1_65, %c0_66, %c0_67] : memref<2x8x8xf32, #tpu.memory_space<vmem>>, vector<1x8x8xf32>
    %187 = vector.shape_cast %186 : vector<1x8x8xf32> to vector<8x8xf32>
    %cst_68 = arith.constant dense<0.000000e+00> : vector<8x256xf32>
    %188 = tpu.matmul %187, %185, %cst_68 {dimension_numbers = #tpu.dot_dimension_numbers<[1], [0], [0], [1], [0, 0, 1, 1], [], []>} : vector<8x8xf32>, vector<8x256xf32>, vector<8x256xf32> -> vector<8x256xf32>
    %189 = vector.broadcast %6 : vector<8x1xf32> to vector<8x256xf32>
    %190 = arith.addf %188, %189 : vector<8x256xf32>
    %191 = arith.negf %190 : vector<8x256xf32>
    %192 = math.exp %191 : vector<8x256xf32>
    %cst_69 = arith.constant 1.000000e+00 : f32
    %193 = vector.broadcast %cst_69 : f32 to vector<8x256xf32>
    %194 = arith.addf %193, %192 : vector<8x256xf32>
    %195 = arith.divf %193, %194 : vector<8x256xf32>
    %196 = arith.mulf %195, %1 : vector<8x256xf32>
    %c0_70 = arith.constant 0 : index
    %c0_71 = arith.constant 0 : index
    %c0_72 = arith.constant 0 : index
    %197 = vector.load %arg6[%c0_70, %c0_71, %c0_72] : memref<1x8x256xf32, #tpu.memory_space<vmem>>, vector<1x8x256xf32>
    %198 = vector.shape_cast %197 : vector<1x8x256xf32> to vector<8x256xf32>
    %199 = vector.shape_cast %196 : vector<8x256xf32> to vector<1x8x256xf32>
    tpu.vector_store %arg6[%c0_70, %c0_71, %c0_72], %199 {strides = array<i32>} : memref<1x8x256xf32, #tpu.memory_space<vmem>>, vector<1x8x256xf32>,
    return
  }
  func.func @transform_0(%arg0: i32) -> (i32, i32, i32) {
    %c0_i32 = arith.constant 0 : i32
    %c0_i32_0 = arith.constant 0 : i32
    %c0_i32_1 = arith.constant 0 : i32
    return %arg0, %c0_i32, %c0_i32_0 : i32, i32, i32
  }
  func.func @transform_1(%arg0: i32) -> (i32, i32, i32) {
    %c0_i32 = arith.constant 0 : i32
    %c0_i32_0 = arith.constant 0 : i32
    %c0_i32_1 = arith.constant 0 : i32
    %c0_i32_2 = arith.constant 0 : i32
    return %c0_i32, %c0_i32_0, %c0_i32_1 : i32, i32, i32
  }
  func.func @transform_2(%arg0: i32) -> (i32, i32, i32, i32) {
    %c0_i32 = arith.constant 0 : i32
    %c0_i32_0 = arith.constant 0 : i32
    %c0_i32_1 = arith.constant 0 : i32
    %c0_i32_2 = arith.constant 0 : i32
    %c0_i32_3 = arith.constant 0 : i32
    return %c0_i32, %c0_i32_0, %c0_i32_1, %c0_i32_2 : i32, i32, i32, i32
  }
  func.func @transform_3(%arg0: i32) -> (i32, i32, i32) {
    %c0_i32 = arith.constant 0 : i32
    %c0_i32_0 = arith.constant 0 : i32
    %c0_i32_1 = arith.constant 0 : i32
    %c0_i32_2 = arith.constant 0 : i32
    return %c0_i32, %c0_i32_0, %c0_i32_1 : i32, i32, i32
  }
  func.func @transform_4(%arg0: i32) -> (i32, i32, i32) {
    %c0_i32 = arith.constant 0 : i32
    %c0_i32_0 = arith.constant 0 : i32
    %c0_i32_1 = arith.constant 0 : i32
    %c0_i32_2 = arith.constant 0 : i32
    return %c0_i32, %c0_i32_0, %c0_i32_1 : i32, i32, i32
  }
  func.func @transform_5(%arg0: i32) -> (i32, i32, i32) {
    %c0_i32 = arith.constant 0 : i32
    %c0_i32_0 = arith.constant 0 : i32
    %c0_i32_1 = arith.constant 0 : i32
    return %arg0, %c0_i32, %c0_i32_0 : i32, i32, i32
  }
}

</mosaic_0001>

<bundles_post_ra>
// kernel: tpu_custom_call.1
= control target key start
LH: loop header
LB: loop body
LE: loop exit
PB: predicated region body
PF: predicated region fallthrough
CT: control target
= control target key end

     0   :  { %v695_v2 = vmov 0   ;;  %s696_s26 = smov 17   ;;  %s1114_s0 = inlined_call_operand.vmem [shape: f32[1,8,256], index: 0, kind: input, shape index: {}]   ;;  %s1115_s1 = inlined_call_operand.vmem [shape: f32[9,1,256], index: 1, kind: input, shape index: {}]   ;;  %s1116_s2 = inlined_call_operand.vmem [shape: f32[2,9,8,1], index: 2, kind: input, shape index: {}]   ;;  %s1117_s3 = inlined_call_operand.vmem [shape: f32[2,8,8], index: 3, kind: input, shape index: {}]   ;;  %s1118_s4 = inlined_call_operand.vmem [shape: f32[2,8,1], index: 4, kind: input, shape index: {}]   ;;  %s1119_s5 = inlined_call_operand.hbm [shape: f32[1,8,256], index: 5, kind: output, shape index: {}]  }
   0x1   :  { %v25_v0 = vld [vmem:[%s1116_s2 + $0x10] sm:$0xff]  ;;  %v23_v1 = vld [vmem:[%s1116_s2] sm:$0xff]  ;;  %662 = vset.pattern.permute.xlu1 %v695_v2  ;;  %661 = vset.pattern.permute.xlu0 %v695_v2  ;;  %v24_v3 = vld [vmem:[%s1116_s2 + $0x8] sm:$0xff] }
   0x2   :  { %129 = vperm.xlu1 %662, %v25_v0   ;;  %69 = vperm.xlu0 %661, %v23_v1   ;;  %v748_v4 = vld [vmem:[%s1114_s0] sm:$0xff]  ;;  %v755_v5 = vld [vmem:[%s1114_s0 + $0x8] sm:$0xff] }
   0x6   :  { %98 = vperm.xlu0 %661, %v24_v3   ;;  %44 = vrot.lane.b32.xlu1 %v748_v4, %s696_s26 }
   0x7   :  { %10 = vsyncpa [#allocation3], 0  ;;  %s697_s29 = smov 16   ;;  %v26_v6 = vld [vmem:[%s1116_s2 + $0x18] sm:$0xff]  ;;  %s698_s7 = smov 15   ;;  %v27_v7 = vld [vmem:[%s1116_s2 + $0x20] sm:$0xff]  ;;  %v48_v31 = vlaneseq }
   0x8   :  { %s699_s9 = smov 1   ;;  %v28_v8 = vld [vmem:[%s1116_s2 + $0x28] sm:$0xff]  ;;  %v29_v9 = vld [vmem:[%s1116_s2 + $0x30] sm:$0xff]  ;;  %s700_s14 = smov 127   ;;  %v30_v10 = vld [vmem:[%s1116_s2 + $0x38] sm:$0xff]  ;;  %v704_v19 = vmov 0.0  }
   0x9   :  { %s701_s17 = smov 113   ;;  %v31_v11 = vld [vmem:[%s1116_s2 + $0x40] sm:$0xff]  ;;  %s702_s20 = smov 112   ;;  %v32_v13 = vld [vmem:[%s1116_s2 + $0x48] sm:$0xff]  ;;  %v33_v14 = vld [vmem:[%s1116_s2 + $0x50] sm:$0xff]  ;;  %374 = vmatprep.mubr.f32.mxu0 %v704_v19  ;;  %600 = vmatprep.mubr.f32.mxu1 %v704_v19  ;;  %v56_v34 = vshrl.u32 %v48_v31, 7 }
   0xa   :  { %46 = vrot.lane.b32.xlu0 %v755_v5, %s696_s26  ;;  %74 = vrot.lane.b32.xlu1 %v748_v4, %s697_s29  ;;  %s703_s21 = smov 111   ;;  %v41_v12 = vld [vmem:[%s1118_s4] sm:$0xff]  ;;  %v34_v15 = vld [vmem:[%s1116_s2 + $0x58] sm:$0xff]  ;;  %v837_v35 = vand.u32 127, %v48_v31  ;;  %vm306_vm8 = vcmask 64512  }
   0xb   :  { %v35_v16 = vld [vmem:[%s1116_s2 + $0x60] sm:$0xff]  ;;  %v36_v17 = vld [vmem:[%s1116_s2 + $0x68] sm:$0xff]  ;;  %v37_v18 = vld [vmem:[%s1116_s2 + $0x70] sm:$0xff]  ;;  %v844_v39 = vsub.s32 0, %v56_v34  ;;  %v846_v40 = vsub.s32 1, %v56_v34 }
   0xc   :  { %v38_v20 = vld [vmem:[%s1116_s2 + $0x78] sm:$0xff]  ;;  %v39_v21 = vld [vmem:[%s1116_s2 + $0x80] sm:$0xff]  ;;  %v40_v22 = vld [vmem:[%s1116_s2 + $0x88] sm:$0xff]  ;;  %vm78_vm0 = vcmp.lt.s32.totalorder %v837_v35, 16  ;;  %vm50_vm1 = vcmp.lt.s32.totalorder %v837_v35, 17  ;;  %vm109_vm2 = vcmp.lt.s32.totalorder %v837_v35, 15 }
   0xd   :  { %v638_v38 = vld [vmem:[%s1115_s1 + $0x2] sm:$0x3]  ;;  %v53_v41 = vld [vmem:[%s1115_s1] sm:$0x3]  ;;  %v639_v42 = vld [vmem:[%s1115_s1 + $0x4] sm:$0x3] }
   0xe   :  { %76 = vrot.lane.b32.xlu0 %v755_v5, %s697_s29  ;;  %160 = vperm.xlu1 %662, %v26_v6   ;;  %v857_v43 = vrot.slane %v638_v38, %v844_v39  ;;  %v860_v44 = vrot.slane %v638_v38, %v846_v40  ;;  %v870_v49 = vrot.slane %v53_v41, %v844_v39  ;;  %v640_v52 = vld [vmem:[%s1115_s1 + $0x6] sm:$0x3]  ;;  %vm140_vm3 = vcmp.lt.s32.totalorder %v837_v35, 1  ;;  %v643_v38 = vld [vmem:[%s1115_s1 + $0xe] sm:$0x3] }
   0xf   :  { %v873_v50 = vrot.slane %v53_v41, %v846_v40  ;;  %v876_v51 = vrot.slane %v639_v42, %v844_v39  ;;  %v886_v55 = vrot.slane %v639_v42, %v846_v40  ;;  %v898_v62 = vrot.slane %v640_v52, %v844_v39 }
  0x10   :  { %v901_v63 = vrot.slane %v640_v52, %v846_v40  ;;  %vm180_vm4 = vcmp.lt.s32.totalorder %v837_v35, 127  ;;  %vm211_vm5 = vcmp.lt.s32.totalorder %v837_v35, 113  ;;  %vm242_vm6 = vcmp.lt.s32.totalorder %v837_v35, 112  ;;  %v644_v52 = vld [vmem:[%s1115_s1 + $0x10] sm:$0x3] }
  0x11   :  { %vm273_vm7 = vcmp.lt.s32.totalorder %v837_v35, 111 }
  0x12   :  { %105 = vrot.lane.b32.xlu0 %v748_v4, %s698_s7  ;;  %107 = vrot.lane.b32.xlu1 %v755_v5, %s698_s7 }
  0x16   :  { %169 = vperm.xlu0 %661, %v27_v7   ;;  %136 = vrot.lane.b32.xlu1 %v748_v4, %s699_s9 }
  0x1a   :  { %138 = vrot.lane.b32.xlu0 %v755_v5, %s699_s9  ;;  %200 = vperm.xlu1 %662, %v28_v8  }
  0x1e   :  { %231 = vperm.xlu0 %661, %v29_v9   ;;  %176 = vrot.lane.b32.xlu1 %v748_v4, %s700_s14 }
  0x22   :  { %178 = vrot.lane.b32.xlu0 %v755_v5, %s700_s14  ;;  %262 = vperm.xlu1 %662, %v30_v10   ;;  %v641_v10 = vld [vmem:[%s1115_s1 + $0xa] sm:$0x3] }
  0x23   :  { %v918_v19 = vrot.slane %v641_v10, %v844_v39 }
  0x26   :  { %207 = vrot.lane.b32.xlu0 %v748_v4, %s701_s17  ;;  %209 = vrot.lane.b32.xlu1 %v755_v5, %s701_s17 }
  0x2a   :  { %293 = vperm.xlu0 %661, %v31_v11   ;;  %238 = vrot.lane.b32.xlu1 %v748_v4, %s702_s20 }
  0x2e   :  { %240 = vrot.lane.b32.xlu0 %v755_v5, %s702_s20  ;;  %269 = vrot.lane.b32.xlu1 %v748_v4, %s703_s21 }
  0x32   :  { %271 = vrot.lane.b32.xlu0 %v755_v5, %s703_s21  ;;  %303 = vperm.xlu1 %662, %v41_v12  }
  0x36   :  { %393 = vperm.xlu0 %661, %v32_v13   ;;  %408 = vperm.xlu1 %662, %v33_v14  }
  0x3a   :  { %425 = vperm.xlu0 %661, %v34_v15   ;;  %442 = vperm.xlu1 %662, %v35_v16  }
  0x3e   :  { %451 = vperm.xlu0 %661, %v36_v17   ;;  %468 = vperm.xlu1 %662, %v37_v18  }
  0x42   :  { %485 = vperm.xlu0 %661, %v38_v20   ;;  %502 = vperm.xlu1 %662, %v39_v21   ;;  %v642_v20 = vld [vmem:[%s1115_s1 + $0xc] sm:$0x3] }
  0x43   :  { %v934_v31 = vrot.slane %v642_v20, %v844_v39 }
  0x46   :  { %519 = vperm.xlu0 %661, %v40_v22  }
  0x81   :  { %v130_v23 = vpop.permute.xlu1 %129  ;;  %v70_v24 = vpop.permute.xlu0 %69 }
  0x85   :  { %v99_v25 = vpop.permute.xlu0 %98  ;;  %v45_v26 = vpop.permute.xlu1 %44 }
  0x89   :  { %v47_v27 = vpop.permute.xlu0 %46  ;;  %v75_v28 = vpop.permute.xlu1 %74 }
  0x8a   :  { %v51_v53 = vsel %vm50_vm1, %v45_v26, %v47_v27  ;;  %v52_v54 = vsel %vm50_vm1, %v47_v27, %v45_v26 }
  0x8b   :  { %v65_v0 = vmul.f32 %v870_v49, %v52_v54  ;;  %v66_v1 = vmul.f32 %v873_v50, %v51_v53 }
  0x8d   :  { %v77_v29 = vpop.permute.xlu0 %76  ;;  %v835_v30 = vpop.permute.xlu1 %160  ;;  %v72_v15 = vmul.f32 %v70_v24, %v65_v0  ;;  %v73_v16 = vmul.f32 %v70_v24, %v66_v1 }
  0x8e   :  { %v79_v47 = vsel %vm78_vm0, %v75_v28, %v77_v29  ;;  %v80_v48 = vsel %vm78_vm0, %v77_v29, %v75_v28 }
  0x8f   :  { %v94_v56 = vmul.f32 %v857_v43, %v80_v48  ;;  %v95_v57 = vmul.f32 %v860_v44, %v79_v47 }
  0x91   :  { %v106_v32 = vpop.permute.xlu0 %105  ;;  %v108_v33 = vpop.permute.xlu1 %107  ;;  %v101_v8 = vmul.f32 %v99_v25, %v94_v56  ;;  %v102_v9 = vmul.f32 %v99_v25, %v95_v57  ;;  %v924_v25 = vrot.slane %v641_v10, %v846_v40  ;;  %v955_v57 = vrot.slane %v643_v38, %v844_v39 }
  0x92   :  { %v110_v58 = vsel %vm109_vm2, %v106_v32, %v108_v33  ;;  %v111_v59 = vsel %vm109_vm2, %v108_v33, %v106_v32  ;;  %v937_v32 = vrot.slane %v642_v20, %v846_v40 }
  0x93   :  { %v125_v6 = vmul.f32 %v876_v51, %v111_v59  ;;  %v126_v7 = vmul.f32 %v886_v55, %v110_v58  ;;  %v103_v21 = vadd.f32 %v101_v8, %v72_v15  ;;  %v104_v22 = vadd.f32 %v102_v9, %v73_v16 }
  0x94   :  { %v958_v58 = vrot.slane %v643_v38, %v846_v40 }
  0x95   :  { %v839_v36 = vpop.permute.xlu0 %169  ;;  %v137_v37 = vpop.permute.xlu1 %136  ;;  %v132_v17 = vmul.f32 %v130_v23, %v125_v6  ;;  %v133_v18 = vmul.f32 %v130_v23, %v126_v7  ;;  %v971_v6 = vrot.slane %v644_v52, %v846_v40 }
  0x96   :  { %v172_v59 = vmul.f32 %v839_v36, %v748_v4 }
  0x97   :  { %v134_v33 = vadd.f32 %v132_v17, %v103_v21  ;;  %v135_v34 = vadd.f32 %v133_v18, %v104_v22 }
  0x99   :  { %v139_v45 = vpop.permute.xlu0 %138  ;;  %v862_v46 = vpop.permute.xlu1 %200 }
  0x9a   :  { %v141_v2 = vsel %vm140_vm3, %v137_v37, %v139_v45  ;;  %v142_v3 = vsel %vm140_vm3, %v139_v45, %v137_v37 }
  0x9b   :  { %v156_v13 = vmul.f32 %v898_v62, %v142_v3  ;;  %v157_v14 = vmul.f32 %v901_v63, %v141_v2  ;;  %v968_v3 = vrot.slane %v644_v52, %v844_v39 }
  0x9d   :  { %v895_v60 = vpop.permute.xlu0 %231  ;;  %v177_v61 = vpop.permute.xlu1 %176  ;;  %v163_v27 = vmul.f32 %v835_v30, %v156_v13  ;;  %v164_v23 = vmul.f32 %v835_v30, %v157_v14 }
  0x9f   :  { %v165_v47 = vadd.f32 %v163_v27, %v134_v33  ;;  %v166_v48 = vadd.f32 %v164_v23, %v135_v34 }
  0xa1   :  { %v179_v11 = vpop.permute.xlu0 %178  ;;  %v263_v12 = vpop.permute.xlu1 %262  ;;  %v174_v7 = vadd.f32 %v172_v59, %v165_v47  ;;  %v637_v47 = vld [vmem:[%s1118_s4 + $0x8] sm:$0xff] }
  0xa2   :  { %v181_v28 = vsel %vm180_vm4, %v177_v61, %v179_v11  ;;  %v182_v29 = vsel %vm180_vm4, %v179_v11, %v177_v61  ;;  %v173_v61 = vmul.f32 %v839_v36, %v755_v5 }
  0xa3   :  { %v196_v41 = vmul.f32 %v918_v19, %v181_v28  ;;  %v197_v42 = vmul.f32 %v924_v25, %v182_v29 }
  0xa4   :  { %v175_v9 = vadd.f32 %v173_v61, %v166_v48 }
  0xa5   :  { %v208_v26 = vpop.permute.xlu0 %207  ;;  %v210_v24 = vpop.permute.xlu1 %209  ;;  %v203_v0 = vmul.f32 %v862_v46, %v196_v41  ;;  %v204_v1 = vmul.f32 %v862_v46, %v197_v42 }
  0xa6   :  { %v212_v37 = vsel %vm211_vm5, %v208_v26, %v210_v24  ;;  %v213_v30 = vsel %vm211_vm5, %v210_v24, %v208_v26 }
  0xa7   :  { %v227_v53 = vmul.f32 %v934_v31, %v212_v37  ;;  %v228_v54 = vmul.f32 %v937_v32, %v213_v30  ;;  %v205_v13 = vadd.f32 %v203_v0, %v174_v7  ;;  %v206_v16 = vadd.f32 %v204_v1, %v175_v9 }
  0xa9   :  { %v294_v45 = vpop.permute.xlu0 %293  ;;  %v239_v56 = vpop.permute.xlu1 %238  ;;  %v234_v10 = vmul.f32 %v895_v60, %v227_v53  ;;  %v235_v11 = vmul.f32 %v895_v60, %v228_v54 }
  0xab   :  { %v237_v22 = vadd.f32 %v235_v11, %v206_v16  ;;  %v236_v26 = vadd.f32 %v234_v10, %v205_v13 }
  0xad   :  { %v241_v2 = vpop.permute.xlu0 %240  ;;  %v270_v40 = vpop.permute.xlu1 %269 }
  0xae   :  { %v243_v8 = vsel %vm242_vm6, %v239_v56, %v241_v2  ;;  %v244_v36 = vsel %vm242_vm6, %v241_v2, %v239_v56 }
  0xaf   :  { %v258_v46 = vmul.f32 %v955_v57, %v243_v8  ;;  %v259_v39 = vmul.f32 %v958_v58, %v244_v36 }
  0xb1   :  { %v265_v14 = vmul.f32 %v263_v12, %v258_v46  ;;  %v272_v15 = vpop.permute.xlu0 %271  ;;  %v266_v17 = vmul.f32 %v263_v12, %v259_v39  ;;  %v300_v12 = vld [vmem:[%s1117_s3] sm:$0xff]  ;;  %v304_v34 = vpop.permute.xlu1 %303 }
  0xb2   :  { %v274_v18 = vsel %vm273_vm7, %v270_v40, %v272_v15  ;;  %v275_v20 = vsel %vm273_vm7, %v272_v15, %v270_v40 }
  0xb3   :  { %v289_v21 = vmul.f32 %v968_v3, %v274_v18  ;;  %v290_v60 = vmul.f32 %v971_v6, %v275_v20  ;;  %v268_v24 = vadd.f32 %v266_v17, %v237_v22  ;;  %v267_v23 = vadd.f32 %v265_v14, %v236_v26 }
  0xb5   :  { %v297_v27 = vmul.f32 %v294_v45, %v290_v60  ;;  %v296_v28 = vmul.f32 %v294_v45, %v289_v21  ;;  %v394_v48 = vpop.permute.xlu0 %393  ;;  %v409_v52 = vpop.permute.xlu1 %408 }
  0xb7   :  { %v299_v29 = vadd.f32 %v297_v27, %v268_v24  ;;  %v298_v33 = vadd.f32 %v296_v28, %v267_v23 }
  0xb9   :  { %310 = vmatprep.subr.mxu0 %v299_v29  ;;  %v426_v53 = vpop.permute.xlu0 %425  ;;  %v443_v54 = vpop.permute.xlu1 %442 }
  0xba   :  { %311 = vmatpush1.msra.mxu0 %v298_v33 }
  0xbb   :  { %645 = vmatmul.mubr.msk.f32.vlgmr.msra.gmra.mrb[0].mxu0 %vm306_vm8, %v300_v12 }
  0xbd   :  { %v452_v56 = vpop.permute.xlu0 %451  ;;  %v1030_v59 = vpop.permute.xlu1 %468 }
  0xc1   :  { %v1032_v61 = vpop.permute.xlu0 %485  ;;  %v1034_v0 = vpop.permute.xlu1 %502 }
  0xc5   :  { %v1036_v1 = vpop.permute.xlu0 %519 }
 0x18e   :  { %v376_v37 = vpop.f32.mrb[0].mxu0 }
 0x18f   :  { %v377_v30 = vadd.f32 %v376_v37, %v304_v34  ;;  %v378_v38 = vpop.f32.mrb[1].mxu0 }
 0x190   :  { %v379_v42 = vadd.f32 %v378_v38, %v304_v34 }
 0x191   :  { %v991_v41 = vmax.f32 %v377_v30, 0.0 }
 0x192   :  { %v1001_v45 = vmax.f32 %v379_v42, 0.0 }
 0x193   :  { %415 = vrot.lane.b32.xlu0 %v991_v41, %s698_s7  ;;  %383 = vrot.lane.b32.xlu1 %v991_v41, %s696_s26 }
 0x197   :  { %475 = vrot.lane.b32.xlu0 %v991_v41, %s701_s17  ;;  %398 = vrot.lane.b32.xlu1 %v991_v41, %s697_s29 }
 0x19b   :  { %385 = vrot.lane.b32.xlu0 %v1001_v45, %s696_s26  ;;  %432 = vrot.lane.b32.xlu1 %v991_v41, %s699_s9 }
 0x19f   :  { %400 = vrot.lane.b32.xlu0 %v1001_v45, %s697_s29  ;;  %458 = vrot.lane.b32.xlu1 %v991_v41, %s700_s14 }
 0x1a3   :  { %434 = vrot.lane.b32.xlu0 %v1001_v45, %s699_s9  ;;  %417 = vrot.lane.b32.xlu1 %v1001_v45, %s698_s7 }
 0x1a7   :  { %460 = vrot.lane.b32.xlu0 %v1001_v45, %s700_s14  ;;  %492 = vrot.lane.b32.xlu1 %v991_v41, %s702_s20 }
 0x1ab   :  { %494 = vrot.lane.b32.xlu0 %v1001_v45, %s702_s20  ;;  %477 = vrot.lane.b32.xlu1 %v1001_v45, %s701_s17 }
 0x1af   :  { %511 = vrot.lane.b32.xlu0 %v1001_v45, %s703_s21  ;;  %509 = vrot.lane.b32.xlu1 %v991_v41, %s703_s21 }
 0x1b3   :  { %530 = vperm.xlu1 %662, %v637_v47  }
 0x205   :  { %v416_v2 = vpop.permute.xlu0 %415  ;;  %v384_v7 = vpop.permute.xlu1 %383 }
 0x209   :  { %v476_v8 = vpop.permute.xlu0 %475  ;;  %v399_v36 = vpop.permute.xlu1 %398 }
 0x20d   :  { %v386_v9 = vpop.permute.xlu0 %385  ;;  %v433_v10 = vpop.permute.xlu1 %432 }
 0x20e   :  { %v387_v11 = vsel %vm50_vm1, %v384_v7, %v386_v9  ;;  %v388_v46 = vsel %vm50_vm1, %v386_v9, %v384_v7 }
 0x20f   :  { %v389_v15 = vmul.f32 %v388_v46, %v870_v49  ;;  %v390_v16 = vmul.f32 %v387_v11, %v873_v50 }
 0x211   :  { %v401_v39 = vpop.permute.xlu0 %400  ;;  %v459_v13 = vpop.permute.xlu1 %458  ;;  %v396_v50 = vmul.f32 %v394_v48, %v389_v15 }
 0x212   :  { %v402_v14 = vsel %vm78_vm0, %v399_v36, %v401_v39  ;;  %v403_v40 = vsel %vm78_vm0, %v401_v39, %v399_v36 }
 0x213   :  { %v404_v17 = vmul.f32 %v403_v40, %v857_v43  ;;  %v405_v18 = vmul.f32 %v402_v14, %v860_v44  ;;  %v397_v43 = vmul.f32 %v394_v48, %v390_v16 }
 0x215   :  { %v411_v20 = vmul.f32 %v409_v52, %v404_v17  ;;  %v412_v21 = vmul.f32 %v409_v52, %v405_v18  ;;  %v435_v60 = vpop.permute.xlu0 %434  ;;  %v418_v22 = vpop.permute.xlu1 %417 }
 0x216   :  { %v436_v26 = vsel %vm140_vm3, %v433_v10, %v435_v60  ;;  %v437_v24 = vsel %vm140_vm3, %v435_v60, %v433_v10  ;;  %v419_v27 = vsel %vm109_vm2, %v416_v2, %v418_v22  ;;  %v420_v49 = vsel %vm109_vm2, %v418_v22, %v416_v2 }
 0x217   :  { %v438_v44 = vmul.f32 %v437_v24, %v898_v62  ;;  %v439_v23 = vmul.f32 %v436_v26, %v901_v63  ;;  %v421_v28 = vmul.f32 %v420_v49, %v876_v51  ;;  %v422_v29 = vmul.f32 %v419_v27, %v886_v55 }
 0x218   :  { %v413_v33 = vadd.f32 %v411_v20, %v396_v50  ;;  %v414_v12 = vadd.f32 %v412_v21, %v397_v43  ;;  %v454_v55 = vmul.f32 %v452_v56, %v991_v41 }
 0x219   :  { %v461_v34 = vpop.permute.xlu0 %460  ;;  %v493_v37 = vpop.permute.xlu1 %492  ;;  %v428_v30 = vmul.f32 %v426_v53, %v421_v28  ;;  %v429_v38 = vmul.f32 %v426_v53, %v422_v29  ;;  %v445_v48 = vmul.f32 %v443_v54, %v438_v44  ;;  %v446_v63 = vmul.f32 %v443_v54, %v439_v23 }
 0x21a   :  { %v462_v42 = vsel %vm180_vm4, %v459_v13, %v461_v34  ;;  %v463_v47 = vsel %vm180_vm4, %v461_v34, %v459_v13  ;;  %v455_v53 = vmul.f32 %v452_v56, %v1001_v45 }
 0x21b   :  { %v464_v62 = vmul.f32 %v462_v42, %v918_v19  ;;  %v430_v52 = vadd.f32 %v428_v30, %v413_v33  ;;  %v431_v51 = vadd.f32 %v429_v38, %v414_v12  ;;  %v465_v2 = vmul.f32 %v463_v47, %v924_v25 }
 0x21d   :  { %v495_v7 = vpop.permute.xlu0 %494  ;;  %v478_v36 = vpop.permute.xlu1 %477  ;;  %v447_v9 = vadd.f32 %v445_v48, %v430_v52  ;;  %v448_v10 = vadd.f32 %v446_v63, %v431_v51  ;;  %v471_v54 = vmul.f32 %v1030_v59, %v464_v62  ;;  %v472_v14 = vmul.f32 %v1030_v59, %v465_v2 }
 0x21e   :  { %v496_v11 = vsel %vm242_vm6, %v493_v37, %v495_v7  ;;  %v497_v19 = vsel %vm242_vm6, %v495_v7, %v493_v37  ;;  %v479_v41 = vsel %vm211_vm5, %v476_v8, %v478_v36  ;;  %v480_v25 = vsel %vm211_vm5, %v478_v36, %v476_v8 }
 0x21f   :  { %v498_v46 = vmul.f32 %v496_v11, %v955_v57  ;;  %v456_v39 = vadd.f32 %v454_v55, %v447_v9  ;;  %v481_v45 = vmul.f32 %v479_v41, %v934_v31  ;;  %v482_v56 = vmul.f32 %v480_v25, %v937_v32 }
 0x220   :  { %v457_v13 = vadd.f32 %v455_v53, %v448_v10  ;;  %v499_v40 = vmul.f32 %v497_v19, %v958_v58 }
 0x221   :  { %v512_v15 = vpop.permute.xlu0 %511  ;;  %v510_v16 = vpop.permute.xlu1 %509  ;;  %v473_v17 = vadd.f32 %v471_v54, %v456_v39  ;;  %v488_v57 = vmul.f32 %v1032_v61, %v481_v45  ;;  %v489_v18 = vmul.f32 %v1032_v61, %v482_v56  ;;  %v505_v59 = vmul.f32 %v1034_v0, %v498_v46 }
 0x222   :  { %v513_v8 = vsel %vm273_vm7, %v510_v16, %v512_v15  ;;  %v514_v31 = vsel %vm273_vm7, %v512_v15, %v510_v16  ;;  %v474_v20 = vadd.f32 %v472_v14, %v457_v13  ;;  %v506_v22 = vmul.f32 %v1034_v0, %v499_v40 }
 0x223   :  { %v515_v32 = vmul.f32 %v513_v8, %v968_v3  ;;  %v516_v58 = vmul.f32 %v514_v31, %v971_v6  ;;  %v490_v21 = vadd.f32 %v488_v57, %v473_v17  ;;  %v646_v3 = vld [vmem:[%s1117_s3 + $0x8] sm:$0xff]  ;;  %s705_s3 = smov [#allocation2]  }
 0x224   :  { %v491_v60 = vadd.f32 %v489_v18, %v474_v20  ;;  %s629_s9 = sshll.u32 %s705_s3, 4  ;;  %s630_s9 = int_to_ptr.vmem [resolvable:$true] %s629_s9 }
 0x225   :  { %v522_v26 = vmul.f32 %v1036_v1, %v515_v32  ;;  %v523_v61 = vmul.f32 %v1036_v1, %v516_v58  ;;  %v507_v24 = vadd.f32 %v505_v59, %v490_v21  ;;  %s671_s14 = scalar_lea.vmem %s630_s9, 256  ;;  %p676_p1 = scmp.lt.s32.totalorder %s630_s9, %s630_s9 }
 0x226   :  { %v508_v27 = vadd.f32 %v506_v22, %v491_v60  ;;  %p672_p0 = scmp.ne.s32.totalorder %s630_s9, %s671_s14  ;;  %p677_p2 = scmp.lt.s32.totalorder %s671_s14, %s671_s14 }
 0x227   :  { %v524_v49 = vadd.f32 %v522_v26, %v507_v24 }
 0x228   :  { %v525_v35 = vadd.f32 %v523_v61, %v508_v27  ;;  %p678_p3 = por %p677_p2, %p676_p1 }
 0x22a   :  { %536 = vmatprep.subr.mxu1 %v525_v35  ;;  %p679_p4 = pnand %p678_p3, %p672_p0 }
 0x22b   :  { %537 = vmatpush1.msra.mxu1 %v524_v49 }
 0x22c   :  { %647 = vmatmul.mubr.msk.f32.vlgmr.msra.gmra.mrb[0].mxu1 %vm306_vm8, %v646_v3 }
 0x232   :  { %v531_v6 = vpop.permute.xlu1 %530 }
 0x2ff   :  { %v602_v50 = vpop.f32.mrb[0].mxu1 }
 0x300   :  { %v603_v43 = vadd.f32 %v602_v50, %v531_v6  ;;  %v604_v0 = vpop.f32.mrb[1].mxu1 }
 0x301   :  { %v605_v44 = vadd.f32 %v604_v0, %v531_v6 }
 0x302   :  { %v648_v23 = vmul.f32 -1.442695, %v603_v43 }
 0x303   :  { %v649_v28 = vmul.f32 -1.442695, %v605_v44 }
 0x304   :  { %663 = vpow2.f32 %v648_v23 }
 0x305   :  { %665 = vpow2.f32 %v649_v28 }
 0x30e   :  { %v664_v1 = vpop.eup %663 }
 0x30f   :  { %v666_v29 = vpop.eup %665  ;;  %v613_v33 = vadd.f32 1.0, %v664_v1 }
 0x310   :  { %v614_v12 = vadd.f32 1.0, %v666_v29 }
 0x311   :  { %667 = vrcp.f32 %v613_v33 }
 0x312   :  { %669 = vrcp.f32 %v614_v12 }
 0x31b   :  { %v668_v34 = vpop.eup %667 }
 0x31c   :  { %v670_v37 = vpop.eup %669  ;;  %v619_v30 = vmul.f32 %v668_v34, %v748_v4 }
 0x31d   :  { %v620_v38 = vmul.f32 %v670_v37, %v755_v5 }
 0x31e   :  { %621 = vst [vmem:[#allocation2] sm:$0xff] %v619_v30 }
 0x31f   :  { %622 = vst [vmem:[#allocation2 + $0x8] sm:$0xff] %v620_v38 }
 0x320   :  { %682 = shalt.err (!%p679_p4)
}
 0x321   :  { %s683_s21 = scalar_lea.hbm %s1119_s5, 256 }
 0x322   :  { %p684_p5 = scmp.ne.s32.totalorder %s1119_s5, %s683_s21  ;;  %p687_p6 = scmp.lt.u32.totalorder %s683_s21, %s1119_s5 }
 0x324   :  { %p689_p7 = pnand %p687_p6, %p684_p5 }
 0x326   :  { %692 = shalt.err (!%p689_p7)
}
 0x327   :  { %632 = dma.vmem_to_hbm [thread:$0]  %s630_s9, 256, %s1119_s5, [#allocation3]  }
 0x328   :  { %693 = dma.done.wait [#allocation3], 256  }
 0x329   :  { %694 = vsyncadd [#allocation3], 4294967040 }
 0x32a   :  { %636 = vsyncpa [#allocation3], 1 }

</bundles_post_ra>
